<compile_context>
chip_gen: v7x
topology: tpu7x:2x2x1
jax: 0.10.0
libtpu: 0.0.40
codegen_flags: <defaults>
</compile_context>

<pallas_src>
import math

import jax
import jax.numpy as jnp
from jax.experimental import pallas as pl
from jax.experimental.pallas import tpu as pltpu

_TARGET_CHUNK_BYTES = 2 * 1024 * 1024   # ~2 MiB per DMA descriptor
_MAX_CHUNKS = 16                        # cap on concurrently outstanding DMAs


def _row_chunks(dim0, nbytes):
    """Split the leading axis into up to _MAX_CHUNKS contiguous (start, size) chunks.

    Leading-axis slices keep whole minor-dim tiles intact, so every chunk is a
    contiguous, layout-aligned HBM range — ideal DMA descriptors.
    """
    if dim0 <= 1 or nbytes <= _TARGET_CHUNK_BYTES:
        return [(0, dim0)]
    n = min(dim0, _MAX_CHUNKS, max(2, math.ceil(nbytes / _TARGET_CHUNK_BYTES)))
    base, rem = divmod(dim0, n)
    chunks = []
    start = 0
    for c in range(n):
        size = base + (1 if c < rem else 0)
        if size == 0:
            continue
        chunks.append((start, size))
        start += size
    return chunks


def _make_dma_copy_kernel(chunks):
    """HBM->HBM activation copy: start every chunk DMA, then wait on all of them.

    No VMEM, no TensorCore vector work — the DMA engines do the entire copy.
    """
    def kernel(x_hbm, act_hbm, sems):
        copies = []
        for idx, (start, size) in enumerate(chunks):
            cp = pltpu.make_async_copy(
                x_hbm.at[pl.ds(start, size)],
                act_hbm.at[pl.ds(start, size)],
                sems.at[idx],
            )
            cp.start()
            copies.append(cp)
        for cp in copies:
            cp.wait()
        # TODO(synk): `operator` is abstract (raises NotImplementedError) in the
        # reference module; there is no further compute to lower here.  The
        # profiling-layer update is also skipped (use_profiling_layer=False).
    return kernel


def fhe_incompatible_forward(x, *, materialize_activation=False):
    """Pallas implementation of FHEIncompatible.forward (base class).

    Args:
      x: jnp array (any shape; NCHW conv-style activations expected).
      materialize_activation: if False (default), return x itself — the
        zero-HBM-traffic aliasing semantics of `self.activation = x`.  If True,
        produce a distinct activation buffer via a pure HBM->HBM DMA copy.

    Returns:
      The recorded activation (identical values/shape/dtype to x).
    """
    if not materialize_activation:
        # Aliasing is strictly faster than any copy and matches PyTorch's
        # `self.activation = x` (which aliases, not copies).
        return x

    orig_shape = x.shape
    x_view = x.reshape((1,) + orig_shape) if x.ndim == 0 else x
    nbytes = x_view.size * jnp.dtype(x_view.dtype).itemsize
    chunks = _row_chunks(x_view.shape[0], nbytes)

    act = pl.pallas_call(
        _make_dma_copy_kernel(chunks),
        out_shape=jax.ShapeDtypeStruct(x_view.shape, x_view.dtype),
        in_specs=[pl.BlockSpec(memory_space=pl.ANY)],
        out_specs=pl.BlockSpec(memory_space=pl.ANY),
        scratch_shapes=[pltpu.SemaphoreType.DMA((len(chunks),))],
        # Pure mem-bound copy: one HBM read + one HBM write, zero FLOPs.
        cost_estimate=pl.CostEstimate(
            flops=0, transcendentals=0, bytes_accessed=2 * nbytes),
    )(x_view)

    return act.reshape(orig_shape) if x.ndim == 0 else act


if __name__ == "__main__":
    key = jax.random.PRNGKey(0)
    k_small, k_large = jax.random.split(key)

    # Small NCHW input consistent with a conv-style module.
    x = jax.random.normal(k_small, (2, 4, 16, 16), dtype=jnp.float32)

    # Default path: alias pass-through (`self.activation = x`), no kernel at all.
    act_alias = fhe_incompatible_forward(x)
    assert act_alias is x

    # Materialized path: single-chunk HBM->HBM DMA copy.
    act = fhe_incompatible_forward(x, materialize_activation=True)
    jax.block_until_ready(act)
    assert act.shape == x.shape
    assert act.dtype == x.dtype
    assert bool(jnp.all(act == x))

    # Larger activation exercising the multi-chunk concurrent-DMA path
    # (8 MiB f32 -> 4 concurrent 2 MiB DMAs along the leading axis).
    xl = jax.random.normal(k_large, (8, 64, 64, 64), dtype=jnp.float32)
    act_l = fhe_incompatible_forward(xl, materialize_activation=True)
    jax.block_until_ready(act_l)
    assert act_l.shape == xl.shape
    assert bool(jnp.all(act_l == xl))

    print("KERNEL_OK")
</pallas_src>

<mosaic_0001>
module attributes {stable_mosaic.version = 11 : i64} {
  func.func @kernel(%arg0: memref<2x4x16x16xf32, #tpu.memory_space<any>>, %arg1: memref<2x4x16x16xf32, #tpu.memory_space<any>>, %arg2: memref<1x!tpu.dma_semaphore, #tpu.memory_space<semaphore_mem>>) attributes {dimension_semantics = [], scalar_prefetch = 0 : i64, scratch_operands = 1 : i64, tpu.core_type = #tpu.core_type<tc>} {
    %c0_i32 = arith.constant 0 : i32
    %c0_i32_0 = arith.constant 0 : i32
    %c0_i32_1 = arith.constant 0 : i32
    %c0_i32_2 = arith.constant 0 : i32
    %c0_i32_3 = arith.constant 0 : i32
    %0 = tpu.memref_slice %arg0[%c0_i32_0, %c0_i32_1, %c0_i32_2, %c0_i32_3] : memref<2x4x16x16xf32, #tpu.memory_space<any>> -> memref<2x4x16x16xf32, #tpu.memory_space<any>>
    %c0_i32_4 = arith.constant 0 : i32
    %c0_i32_5 = arith.constant 0 : i32
    %c0_i32_6 = arith.constant 0 : i32
    %c0_i32_7 = arith.constant 0 : i32
    %1 = tpu.memref_slice %arg1[%c0_i32_4, %c0_i32_5, %c0_i32_6, %c0_i32_7] : memref<2x4x16x16xf32, #tpu.memory_space<any>> -> memref<2x4x16x16xf32, #tpu.memory_space<any>>
    %2 = tpu.memref_slice %arg2[%c0_i32] : memref<1x!tpu.dma_semaphore, #tpu.memory_space<semaphore_mem>> -> memref<1x!tpu.dma_semaphore, #tpu.memory_space<semaphore_mem>>
    %3 = tpu.memref_squeeze %2 : memref<1x!tpu.dma_semaphore, #tpu.memory_space<semaphore_mem>> -> memref<!tpu.dma_semaphore, #tpu.memory_space<semaphore_mem>>
    tpu.enqueue_dma source(%0 : memref<2x4x16x16xf32, #tpu.memory_space<any>>) target(%1 : memref<2x4x16x16xf32, #tpu.memory_space<any>>) target_semaphore(%3 : memref<!tpu.dma_semaphore, #tpu.memory_space<semaphore_mem>>)
    %c0_i32_8 = arith.constant 0 : i32
    %c0_i32_9 = arith.constant 0 : i32
    %c0_i32_10 = arith.constant 0 : i32
    %c0_i32_11 = arith.constant 0 : i32
    %c0_i32_12 = arith.constant 0 : i32
    %4 = tpu.memref_slice %arg0[%c0_i32_9, %c0_i32_10, %c0_i32_11, %c0_i32_12] : memref<2x4x16x16xf32, #tpu.memory_space<any>> -> memref<2x4x16x16xf32, #tpu.memory_space<any>>
    %c0_i32_13 = arith.constant 0 : i32
    %c0_i32_14 = arith.constant 0 : i32
    %c0_i32_15 = arith.constant 0 : i32
    %c0_i32_16 = arith.constant 0 : i32
    %5 = tpu.memref_slice %arg1[%c0_i32_13, %c0_i32_14, %c0_i32_15, %c0_i32_16] : memref<2x4x16x16xf32, #tpu.memory_space<any>> -> memref<2x4x16x16xf32, #tpu.memory_space<any>>
    %6 = tpu.memref_slice %arg2[%c0_i32_8] : memref<1x!tpu.dma_semaphore, #tpu.memory_space<semaphore_mem>> -> memref<1x!tpu.dma_semaphore, #tpu.memory_space<semaphore_mem>>
    %7 = tpu.memref_squeeze %6 : memref<1x!tpu.dma_semaphore, #tpu.memory_space<semaphore_mem>> -> memref<!tpu.dma_semaphore, #tpu.memory_space<semaphore_mem>>
    tpu.wait_dma2 semaphore(%7 : memref<!tpu.dma_semaphore, #tpu.memory_space<semaphore_mem>>) src(%4 : memref<2x4x16x16xf32, #tpu.memory_space<any>>) dst(%5 : memref<2x4x16x16xf32, #tpu.memory_space<any>>)
    return
  }
}

</mosaic_0001>

<bundles_post_ra>
// kernel: tpu_custom_call.1
= control target key start
LH: loop header
LB: loop body
LE: loop exit
PB: predicated region body
PF: predicated region fallthrough
CT: control target
= control target key end

     0   :  { %s36_s6 = smov [#allocation2]   ;;  %s37_s7 = smov [#allocation3]   ;;  %s55_s0 = inlined_call_operand.hbm [shape: f32[2,4,16,16], index: 0, kind: input, shape index: {}]   ;;  %s56_s1 = inlined_call_operand.hbm [shape: f32[2,4,16,16], index: 1, kind: output, shape index: {}]  }
   0x1   :  { %s38_s8 = smov 0  }
   0x2   :  { %18 = dma.general %s55_s0, 2048, %s56_s1, %s36_s6, %s37_s7, [#allocation4], %s38_s8, 0  }
   0x3   :  { %34 = dma.done.wait [#allocation2], 2048 }
   0x4   :  { %35 = vsyncadd [#allocation2], 4294965248 }
   0x5   :  { %24 = vsyncmov [#allocation2] }
   0x8   :  { %s25_s13 = vpop.sfrf %24 }
   0x9   :  { %p30_p0 = scmp.ne.s32.totalorder %s25_s13, 0 }
   0xb   :  { %29 = shalt.err (%p30_p0)  }

</bundles_post_ra>
